<compile_context>
chip_gen: v7x
topology: tpu7x:2x2x1
jax: 0.10.0
libtpu: 0.0.40
codegen_flags: <defaults>
</compile_context>

<pallas_src>
import math

import jax
import jax.numpy as jnp
from jax.experimental import pallas as pl
from jax.experimental.pallas import tpu as pltpu


def _round_up(x, m):
    return ((x + m - 1) // m) * m


# ---------------------------------------------------------------------------
# Kernels
# ---------------------------------------------------------------------------
def _planar_kernel_rows(scal_ref, z_ref, logp_ref, w_ref, u_ref, f_ref, qf_ref):
    """Row layout: z is (TILE_B, ND) — batch on sublanes, features on lanes."""
    b = scal_ref[0]
    wu = scal_ref[1]
    z = z_ref[...].astype(jnp.float32)          # (TB, ND)
    logp = logp_ref[...].astype(jnp.float32)    # (TB, 1)
    w = w_ref[...].astype(jnp.float32)          # (1, ND)
    u = u_ref[...].astype(jnp.float32)          # (1, ND)

    # mat-vec as VPU multiply + lane reduce (MXU is the wrong unit for N=1).
    h1 = jnp.tanh(jnp.sum(z * w, axis=-1, keepdims=True) + b)   # (TB, 1)
    z1 = z + u * h1
    h2 = jnp.tanh(jnp.sum(z1 * w, axis=-1, keepdims=True) + b)  # (TB, 1)
    f_ref[...] = (z1 + u * h2).astype(f_ref.dtype)

    detgrad = 1.0 + (1.0 - h2 * h2) * wu
    qf_ref[...] = (logp - jnp.log(detgrad + 1e-8)).astype(qf_ref.dtype)


def _planar_kernel_lanes(scal_ref, z_ref, logp_ref, w_ref, u_ref, f_ref, qf_ref):
    """Lane layout (transposed): z is (ND, TILE_B) — batch on lanes (small ND)."""
    b = scal_ref[0]
    wu = scal_ref[1]
    z = z_ref[...].astype(jnp.float32)          # (ND, TB)
    logp = logp_ref[...].astype(jnp.float32)    # (1, TB)
    w = w_ref[...].astype(jnp.float32)          # (ND, 1)
    u = u_ref[...].astype(jnp.float32)          # (ND, 1)

    h1 = jnp.tanh(jnp.sum(z * w, axis=0, keepdims=True) + b)    # (1, TB)
    z1 = z + u * h1
    h2 = jnp.tanh(jnp.sum(z1 * w, axis=0, keepdims=True) + b)   # (1, TB)
    f_ref[...] = (z1 + u * h2).astype(f_ref.dtype)

    detgrad = 1.0 + (1.0 - h2 * h2) * wu
    qf_ref[...] = (logp - jnp.log(detgrad + 1e-8)).astype(qf_ref.dtype)


# ---------------------------------------------------------------------------
# Wrapper
# ---------------------------------------------------------------------------
def _choose_tile_b(batch, nd, in_bytes, out_bytes, align):
    """Largest batch tile that keeps double-buffered VMEM well under budget."""
    budget = 8 * 1024 * 1024  # conservative: fits v7x's 64 MiB VMEM with headroom
    per_row = (nd + 1) * (in_bytes + out_bytes) * 2  # z/logp in + f/qf out, x2 buffers
    tile = budget // max(per_row, 1)
    tile = max(align, (tile // align) * align)
    tile = min(tile, 2048)                       # mem-bound sweet spot: 512-2048 rows
    tile = min(tile, _round_up(batch, align))
    return int(tile)


def planar_flow_forward(z, logp, w, u, b):
    """z: (B, ND), logp: (B, 1) or (B,), w/u: (ND,), b: scalar/(1,) -> (f, qf)."""
    B, ND = z.shape
    logp = logp.reshape(B, 1)

    # Grid-invariant scalars precomputed once: bias b and wu = w . u (SMEM).
    wu = jnp.dot(w.astype(jnp.float32), u.astype(jnp.float32))
    scal = jnp.stack([b.reshape(()).astype(jnp.float32), wu])   # (2,) f32

    in_bytes = jnp.dtype(z.dtype).itemsize
    out_bytes = in_bytes
    lp_bytes = jnp.dtype(logp.dtype).itemsize

    compiler_params = pltpu.CompilerParams(
        dimension_semantics=("parallel",),
        vmem_limit_bytes=32 * 1024 * 1024,
    )
    cost = pl.CostEstimate(
        flops=8 * B * ND,
        transcendentals=3 * B,
        bytes_accessed=2 * B * ND * in_bytes + 2 * B * lp_bytes + 2 * ND * in_bytes,
    )

    lane_layout = (ND % 128) != 0  # small / unaligned feature dim -> batch on lanes

    if lane_layout:
        tile_b = _choose_tile_b(B, ND, in_bytes, out_bytes, align=128)
        b_pad = _round_up(B, tile_b)
        zt = z.T                    # (ND, B)   layout plumbing only, no compute
        lpt = logp.T                # (1, B)
        if b_pad != B:
            zt = jnp.pad(zt, ((0, 0), (0, b_pad - B)))
            lpt = jnp.pad(lpt, ((0, 0), (0, b_pad - B)))
        w2 = w.reshape(ND, 1)
        u2 = u.reshape(ND, 1)

        f_t, qf_t = pl.pallas_call(
            _planar_kernel_lanes,
            out_shape=(
                jax.ShapeDtypeStruct((ND, b_pad), z.dtype),
                jax.ShapeDtypeStruct((1, b_pad), logp.dtype),
            ),
            grid_spec=pltpu.PrefetchScalarGridSpec(
                num_scalar_prefetch=1,
                grid=(b_pad // tile_b,),
                in_specs=[
                    pl.BlockSpec((ND, tile_b), lambda i, s: (0, i)),  # z^T
                    pl.BlockSpec((1, tile_b), lambda i, s: (0, i)),   # logp^T
                    pl.BlockSpec((ND, 1), lambda i, s: (0, 0)),       # w (resident)
                    pl.BlockSpec((ND, 1), lambda i, s: (0, 0)),       # u (resident)
                ],
                out_specs=(
                    pl.BlockSpec((ND, tile_b), lambda i, s: (0, i)),  # f^T (lane-dense)
                    pl.BlockSpec((1, tile_b), lambda i, s: (0, i)),   # qf^T (lane-dense)
                ),
            ),
            compiler_params=compiler_params,
            cost_estimate=cost,
        )(scal, zt, lpt, w2, u2)
        return f_t.T[:B], qf_t.T[:B]

    # ND is a multiple of 128: keep (B, ND) layout, tile over batch rows.
    tile_b = _choose_tile_b(B, ND, in_bytes, out_bytes, align=8)
    b_pad = _round_up(B, tile_b)
    zp, lpp = z, logp
    if b_pad != B:
        zp = jnp.pad(zp, ((0, b_pad - B), (0, 0)))
        lpp = jnp.pad(lpp, ((0, b_pad - B), (0, 0)))
    w2 = w.reshape(1, ND)
    u2 = u.reshape(1, ND)

    f, qf = pl.pallas_call(
        _planar_kernel_rows,
        out_shape=(
            jax.ShapeDtypeStruct((b_pad, ND), z.dtype),
            jax.ShapeDtypeStruct((b_pad, 1), logp.dtype),
        ),
        grid_spec=pltpu.PrefetchScalarGridSpec(
            num_scalar_prefetch=1,
            grid=(b_pad // tile_b,),
            in_specs=[
                pl.BlockSpec((tile_b, ND), lambda i, s: (i, 0)),      # z
                pl.BlockSpec((tile_b, 1), lambda i, s: (i, 0)),       # logp
                pl.BlockSpec((1, ND), lambda i, s: (0, 0)),           # w (resident)
                pl.BlockSpec((1, ND), lambda i, s: (0, 0)),           # u (resident)
            ],
            out_specs=(
                pl.BlockSpec((tile_b, ND), lambda i, s: (i, 0)),      # f
                pl.BlockSpec((tile_b, 1), lambda i, s: (i, 0)),       # qf
            ),
        ),
        compiler_params=compiler_params,
        cost_estimate=cost,
    )(scal, zp, lpp, w2, u2)
    return f[:B], qf[:B]


# ---------------------------------------------------------------------------
# Init + pure-JAX reference
# ---------------------------------------------------------------------------
def init_planar_flow_params(key, nd):
    """Deterministic init mirroring PlanarFlow.reset_parameters()."""
    ku, kw = jax.random.split(key)
    stdv = 1.0 / math.sqrt(nd)
    u = jax.random.uniform(ku, (nd,), jnp.float32, minval=-stdv, maxval=stdv)
    w = jax.random.uniform(kw, (nd,), jnp.float32, minval=-stdv, maxval=stdv)
    b = jnp.zeros((1,), jnp.float32)
    # make_invertible()
    dot = jnp.dot(u, w)
    m = -1.0 + jnp.log1p(jnp.exp(dot))
    u = u + (m - dot) / jnp.linalg.norm(w) * w
    return u, w, b


def planar_flow_ref(z, logp, w, u, b):
    h1 = jnp.tanh(z @ w[:, None] + b)                  # (B, 1)
    z1 = z + u[None, :] * h1
    h2 = jnp.tanh(z1 @ w[:, None] + b)
    f = z1 + u[None, :] * h2
    detgrad = 1.0 + (1.0 - h2 ** 2) * jnp.dot(w, u)
    qf = logp - jnp.log(detgrad + 1e-8)
    return f, qf


if __name__ == "__main__":
    key = jax.random.PRNGKey(0)
    ok = True
    # (8, 32): exercises the transposed lane-dense path (ND < 128).
    # (16, 128): exercises the native (B, ND) row path (ND % 128 == 0).
    for (B, ND) in [(8, 32), (16, 128)]:
        kp, kz, kl, key = jax.random.split(key, 4)
        u, w, b = init_planar_flow_params(kp, ND)
        z = jax.random.normal(kz, (B, ND), jnp.float32)
        logp = jax.random.normal(kl, (B, 1), jnp.float32)

        f, qf = planar_flow_forward(z, logp, w, u, b)
        f = jax.block_until_ready(f)
        qf = jax.block_until_ready(qf)

        f_ref, qf_ref = planar_flow_ref(z, logp, w, u, b)
        ok &= bool(jnp.allclose(f, f_ref, atol=1e-5, rtol=1e-5))
        ok &= bool(jnp.allclose(qf, qf_ref, atol=1e-5, rtol=1e-5))

    if not ok:
        raise SystemExit("mismatch vs reference")
    print("KERNEL_OK")
</pallas_src>

<mosaic_0001>
module attributes {stable_mosaic.version = 11 : i64} {
  func.func @_planar_kernel_lanes(%arg0: i32, %arg1: memref<2xf32, #tpu.memory_space<smem>>, %arg2: memref<32x128xf32, #tpu.memory_space<vmem>>, %arg3: memref<1x128xf32, #tpu.memory_space<vmem>>, %arg4: memref<32x1xf32, #tpu.memory_space<vmem>>, %arg5: memref<32x1xf32, #tpu.memory_space<vmem>>, %arg6: memref<32x128xf32, #tpu.memory_space<vmem>>, %arg7: memref<1x128xf32, #tpu.memory_space<vmem>>) attributes {dimension_semantics = [#tpu.dimension_semantics<parallel>], iteration_bounds = array<i64: 1>, scalar_prefetch = 1 : i64, scratch_operands = 0 : i64, tpu.core_type = #tpu.core_type<tc>, window_params = [{transform_indices = @transform_0, window_bounds = array<i64: 32, 128>}, {transform_indices = @transform_1, window_bounds = array<i64: 1, 128>}, {pipeline_mode = #tpu.pipeline_mode<synchronous>, transform_indices = @transform_2, window_bounds = array<i64: 32, 1>}, {pipeline_mode = #tpu.pipeline_mode<synchronous>, transform_indices = @transform_3, window_bounds = array<i64: 32, 1>}, {transform_indices = @transform_4, window_bounds = array<i64: 32, 128>}, {transform_indices = @transform_5, window_bounds = array<i64: 1, 128>}]} {
    %c0 = arith.constant 0 : index
    %0 = memref.load %arg1[%c0] : memref<2xf32, #tpu.memory_space<smem>>
    %c1 = arith.constant 1 : index
    %1 = memref.load %arg1[%c1] : memref<2xf32, #tpu.memory_space<smem>>
    %c0_0 = arith.constant 0 : index
    %c0_1 = arith.constant 0 : index
    %2 = vector.load %arg2[%c0_0, %c0_1] : memref<32x128xf32, #tpu.memory_space<vmem>>, vector<32x128xf32>
    %c0_2 = arith.constant 0 : index
    %c0_3 = arith.constant 0 : index
    %3 = vector.load %arg3[%c0_2, %c0_3] : memref<1x128xf32, #tpu.memory_space<vmem>>, vector<1x128xf32>
    %c0_4 = arith.constant 0 : index
    %c0_5 = arith.constant 0 : index
    %4 = vector.load %arg4[%c0_4, %c0_5] : memref<32x1xf32, #tpu.memory_space<vmem>>, vector<32x1xf32>
    %c0_6 = arith.constant 0 : index
    %c0_7 = arith.constant 0 : index
    %5 = vector.load %arg5[%c0_6, %c0_7] : memref<32x1xf32, #tpu.memory_space<vmem>>, vector<32x1xf32>
    %6 = vector.broadcast %4 : vector<32x1xf32> to vector<32x128xf32>
    %7 = arith.mulf %2, %6 : vector<32x128xf32>
    %cst = arith.constant dense<0.000000e+00> : vector<128xf32>
    %8 = vector.multi_reduction <add>, %7, %cst [0] : vector<32x128xf32> to vector<128xf32>
    %9 = vector.shape_cast %8 : vector<128xf32> to vector<1x128xf32>
    %10 = vector.broadcast %0 : f32 to vector<1x128xf32>
    %11 = arith.addf %9, %10 : vector<1x128xf32>
    %12 = math.tanh %11 : vector<1x128xf32>
    %13 = vector.broadcast %5 : vector<32x1xf32> to vector<32x128xf32>
    %14 = vector.broadcast %12 : vector<1x128xf32> to vector<32x128xf32>
    %15 = arith.mulf %13, %14 : vector<32x128xf32>
    %16 = arith.addf %2, %15 : vector<32x128xf32>
    %17 = vector.broadcast %4 : vector<32x1xf32> to vector<32x128xf32>
    %18 = arith.mulf %16, %17 : vector<32x128xf32>
    %cst_8 = arith.constant dense<0.000000e+00> : vector<128xf32>
    %19 = vector.multi_reduction <add>, %18, %cst_8 [0] : vector<32x128xf32> to vector<128xf32>
    %20 = vector.shape_cast %19 : vector<128xf32> to vector<1x128xf32>
    %21 = vector.broadcast %0 : f32 to vector<1x128xf32>
    %22 = arith.addf %20, %21 : vector<1x128xf32>
    %23 = math.tanh %22 : vector<1x128xf32>
    %24 = vector.broadcast %5 : vector<32x1xf32> to vector<32x128xf32>
    %25 = vector.broadcast %23 : vector<1x128xf32> to vector<32x128xf32>
    %26 = arith.mulf %24, %25 : vector<32x128xf32>
    %27 = arith.addf %16, %26 : vector<32x128xf32>
    %c0_9 = arith.constant 0 : index
    %c0_10 = arith.constant 0 : index
    %28 = vector.load %arg6[%c0_9, %c0_10] : memref<32x128xf32, #tpu.memory_space<vmem>>, vector<32x128xf32>
    tpu.vector_store %arg6[%c0_9, %c0_10], %27 {strides = array<i32>} : memref<32x128xf32, #tpu.memory_space<vmem>>, vector<32x128xf32>,
    %29 = arith.mulf %23, %23 : vector<1x128xf32>
    %cst_11 = arith.constant 1.000000e+00 : f32
    %30 = vector.broadcast %cst_11 : f32 to vector<1x128xf32>
    %31 = arith.subf %30, %29 : vector<1x128xf32>
    %32 = vector.broadcast %1 : f32 to vector<1x128xf32>
    %33 = arith.mulf %31, %32 : vector<1x128xf32>
    %cst_12 = arith.constant 1.000000e+00 : f32
    %34 = vector.broadcast %cst_12 : f32 to vector<1x128xf32>
    %35 = arith.addf %34, %33 : vector<1x128xf32>
    %cst_13 = arith.constant 9.99999993E-9 : f32
    %36 = vector.broadcast %cst_13 : f32 to vector<1x128xf32>
    %37 = arith.addf %35, %36 : vector<1x128xf32>
    %38 = math.log %37 : vector<1x128xf32>
    %39 = arith.subf %3, %38 : vector<1x128xf32>
    %c0_14 = arith.constant 0 : index
    %c0_15 = arith.constant 0 : index
    %40 = vector.load %arg7[%c0_14, %c0_15] : memref<1x128xf32, #tpu.memory_space<vmem>>, vector<1x128xf32>
    tpu.vector_store %arg7[%c0_14, %c0_15], %39 {strides = array<i32>} : memref<1x128xf32, #tpu.memory_space<vmem>>, vector<1x128xf32>,
    return
  }
  func.func @transform_0(%arg0: i32, %arg1: memref<2xf32, #tpu.memory_space<smem>>) -> (i32, i32) {
    %c0_i32 = arith.constant 0 : i32
    %c0_i32_0 = arith.constant 0 : i32
    return %c0_i32, %arg0 : i32, i32
  }
  func.func @transform_1(%arg0: i32, %arg1: memref<2xf32, #tpu.memory_space<smem>>) -> (i32, i32) {
    %c0_i32 = arith.constant 0 : i32
    %c0_i32_0 = arith.constant 0 : i32
    return %c0_i32, %arg0 : i32, i32
  }
  func.func @transform_2(%arg0: i32, %arg1: memref<2xf32, #tpu.memory_space<smem>>) -> (i32, i32) {
    %c0_i32 = arith.constant 0 : i32
    %c0_i32_0 = arith.constant 0 : i32
    %c0_i32_1 = arith.constant 0 : i32
    return %c0_i32, %c0_i32_0 : i32, i32
  }
  func.func @transform_3(%arg0: i32, %arg1: memref<2xf32, #tpu.memory_space<smem>>) -> (i32, i32) {
    %c0_i32 = arith.constant 0 : i32
    %c0_i32_0 = arith.constant 0 : i32
    %c0_i32_1 = arith.constant 0 : i32
    return %c0_i32, %c0_i32_0 : i32, i32
  }
  func.func @transform_4(%arg0: i32, %arg1: memref<2xf32, #tpu.memory_space<smem>>) -> (i32, i32) {
    %c0_i32 = arith.constant 0 : i32
    %c0_i32_0 = arith.constant 0 : i32
    return %c0_i32, %arg0 : i32, i32
  }
  func.func @transform_5(%arg0: i32, %arg1: memref<2xf32, #tpu.memory_space<smem>>) -> (i32, i32) {
    %c0_i32 = arith.constant 0 : i32
    %c0_i32_0 = arith.constant 0 : i32
    return %c0_i32, %arg0 : i32, i32
  }
}

</mosaic_0001>

<bundles_post_ra>
// kernel: tpu_custom_call.1
= control target key start
LH: loop header
LB: loop body
LE: loop exit
PB: predicated region body
PF: predicated region fallthrough
CT: control target
= control target key end

     0   :  { %s364_s0 = inlined_call_operand.vmem [shape: f32[2], index: 0, kind: input, shape index: {}]   ;;  %s365_s1 = inlined_call_operand.vmem [shape: f32[32,128], index: 1, kind: input, shape index: {}]   ;;  %s366_s2 = inlined_call_operand.vmem [shape: f32[1,128], index: 2, kind: input, shape index: {}]   ;;  %s367_s3 = inlined_call_operand.vmem [shape: f32[32,1], index: 3, kind: input, shape index: {}]   ;;  %s368_s4 = inlined_call_operand.vmem [shape: f32[32,1], index: 4, kind: input, shape index: {}]   ;;  %s369_s5 = inlined_call_operand.hbm [shape: f32[32,128], index: 5, kind: output, shape index: {0}]   ;;  %s370_s6 = inlined_call_operand.hbm [shape: f32[1,128], index: 6, kind: output, shape index: {1}]  }
   0x1   :  { %s12_s23 = sshll.u32 %s364_s0, 4  ;;  %s13_s23 = int_to_ptr.vmem [resolvable:$true] %s12_s23 }
   0x2   :  { %s189_s24 = scalar_lea.vmem %s13_s23, 16  ;;  %p194_p1 = scmp.lt.s32.totalorder %s13_s23, %s13_s23 }
   0x3   :  { %p190_p0 = scmp.ne.s32.totalorder %s13_s23, %s189_s24  ;;  %p195_p2 = scmp.lt.s32.totalorder %s189_s24, %s189_s24 }
   0x5   :  { %p196_p3 = por %p195_p2, %p194_p1 }
   0x7   :  { %p197_p4 = pnand %p196_p3, %p190_p0 }
   0x9   :  { %200 = shalt.err (!%p197_p4)  }
   0xa   :  { %s251_s25 = smov [#allocation3]  }
   0xb   :  { %15 = dma.vmem_to_smem %s13_s23, 16, %s251_s25, [#allocation2] }
   0xc   :  { %245 = dma.done.wait [#allocation2], 16 }
   0xd   :  { %246 = vsyncadd [#allocation2], 4294967280 }
   0xe   :  { %17 = sfence }
   0xf   :  { %18 = vsyncpa [#allocation5], 0  ;;  %v37_v0 = vld [vmem:[%s367_s3 + $0x10] sm:$0xff]  ;;  %v35_v1 = vld [vmem:[%s367_s3] sm:$0xff]  ;;  %v252_v2 = vmov 0  }
  0x10   :  { %182 = vset.pattern.permute.xlu1 %v252_v2  ;;  %181 = vset.pattern.permute.xlu0 %v252_v2  ;;  %v38_v3 = vld [vmem:[%s367_s3 + $0x18] sm:$0xff]  ;;  %v36_v4 = vld [vmem:[%s367_s3 + $0x8] sm:$0xff] }
  0x11   :  { %55 = vperm.xlu1 %182, %v37_v0   ;;  %45 = vperm.xlu0 %181, %v35_v1  }
  0x12   :  { %19 = vsyncpa [#allocation7], 0  ;;  %v40_v5 = vld [vmem:[%s368_s4 + $0x8] sm:$0xff]  ;;  %v39_v6 = vld [vmem:[%s368_s4] sm:$0xff]  ;;  %s331_s23 = sld [smem:[#allocation3]]  ;;  %s253_s24 = smov [#allocation4]  }
  0x13   :  { %v42_v7 = vld [vmem:[%s368_s4 + $0x18] sm:$0xff]  ;;  %v41_v8 = vld [vmem:[%s368_s4 + $0x10] sm:$0xff]  ;;  %v30_v11 = vld [vmem:[%s365_s1] sm:$0xff]  ;;  %s149_s25 = sshll.u32 %s253_s24, 4  ;;  %s150_s25 = int_to_ptr.vmem [resolvable:$true] %s149_s25 }
  0x14   :  { %v31_v12 = vld [vmem:[%s365_s1 + $0x8] sm:$0xff]  ;;  %v32_v13 = vld [vmem:[%s365_s1 + $0x10] sm:$0xff]  ;;  %v33_v18 = vld [vmem:[%s365_s1 + $0x18] sm:$0xff]  ;;  %s334_s1 = sld [smem:[#allocation3 + $0x1]]  ;;  %s201_s26 = scalar_lea.vmem %s150_s25, 512 }
  0x15   :  { %60 = vperm.xlu1 %182, %v38_v3   ;;  %50 = vperm.xlu0 %181, %v36_v4   ;;  %p202_p5 = scmp.ne.s32.totalorder %s150_s25, %s201_s26  ;;  %p206_p6 = scmp.lt.s32.totalorder %s150_s25, %s150_s25 }
  0x16   :  { %p207_p7 = scmp.lt.s32.totalorder %s201_s26, %s201_s26 }
  0x18   :  { %v76_v29 = vstv %s331_s23  ;;  %p208_p8 = por %p207_p7, %p206_p6 }
  0x19   :  { %86 = vperm.xlu1 %182, %v40_v5   ;;  %81 = vperm.xlu0 %181, %v39_v6  }
  0x1a   :  { %v136_v1 = vstv %s334_s1  ;;  %p209_p9 = pnand %p208_p8, %p202_p5 }
  0x1d   :  { %96 = vperm.xlu1 %182, %v42_v7   ;;  %91 = vperm.xlu0 %181, %v41_v8  }
  0x90   :  { %v56_v9 = vpop.permute.xlu1 %55  ;;  %v46_v10 = vpop.permute.xlu0 %45 }
  0x91   :  { %v63_v15 = vmul.f32 %v46_v10, %v30_v11  ;;  %v65_v19 = vmul.f32 %v56_v9, %v32_v13 }
  0x94   :  { %v51_v14 = vpop.permute.xlu0 %50  ;;  %v61_v17 = vpop.permute.xlu1 %60 }
  0x95   :  { %v64_v16 = vmul.f32 %v51_v14, %v31_v12  ;;  %v66_v21 = vmul.f32 %v61_v17, %v33_v18 }
  0x97   :  { %v67_v20 = vadd.f32 %v64_v16, %v63_v15 }
  0x98   :  { %v87_v32 = vpop.permute.xlu1 %86  ;;  %v82_v33 = vpop.permute.xlu0 %81 }
  0x99   :  { %v68_v22 = vadd.f32 %v67_v20, %v65_v19 }
  0x9b   :  { %v69_v23 = vadd.f32 %v68_v22, %v66_v21 }
  0x9c   :  { %v97_v35 = vpop.permute.xlu1 %96  ;;  %v92_v36 = vpop.permute.xlu0 %91 }
  0x9d   :  { %v70_v24 = vrot.slane %v69_v23, 4 }
  0x9f   :  { %v71_v25 = vadd.f32 %v70_v24, %v69_v23 }
  0xa1   :  { %v72_v26 = vrot.slane %v71_v25, 2 }
  0xa3   :  { %v73_v27 = vadd.f32 %v72_v26, %v71_v25 }
  0xa5   :  { %v74_v28 = vrot.slane %v73_v27, 1 }
  0xa7   :  { %v75_v30 = vadd.f32 %v74_v28, %v73_v27 }
  0xa9   :  { %v77_v31 = vadd.f32 %v76_v29, %v75_v30 }
  0xab   :  { %183 = vtanh.f32 %v77_v31 }
  0xb5   :  { %v184_v34 = vpop.eup %183 }
  0xb6   :  { %v100_v37 = vmul.f32 %v184_v34, %v87_v32  ;;  %v99_v38 = vmul.f32 %v184_v34, %v82_v33  ;;  %v102_v39 = vmul.f32 %v184_v34, %v97_v35  ;;  %v101_v40 = vmul.f32 %v184_v34, %v92_v36 }
  0xb8   :  { %v104_v41 = vadd.f32 %v100_v37, %v31_v12  ;;  %v103_v42 = vadd.f32 %v99_v38, %v30_v11  ;;  %v105_v43 = vadd.f32 %v101_v40, %v32_v13  ;;  %v106_v46 = vadd.f32 %v102_v39, %v33_v18 }
  0xba   :  { %v108_v44 = vmul.f32 %v104_v41, %v51_v14  ;;  %v107_v45 = vmul.f32 %v103_v42, %v46_v10  ;;  %v109_v48 = vmul.f32 %v105_v43, %v56_v9  ;;  %v110_v49 = vmul.f32 %v106_v46, %v61_v17 }
  0xbc   :  { %v111_v47 = vadd.f32 %v108_v44, %v107_v45 }
  0xbe   :  { %v112_v50 = vadd.f32 %v111_v47, %v109_v48 }
  0xc0   :  { %v113_v51 = vadd.f32 %v112_v50, %v110_v49 }
  0xc2   :  { %v114_v52 = vrot.slane %v113_v51, 4 }
  0xc4   :  { %v115_v53 = vadd.f32 %v114_v52, %v113_v51 }
  0xc6   :  { %v116_v54 = vrot.slane %v115_v53, 2 }
  0xc8   :  { %v117_v55 = vadd.f32 %v116_v54, %v115_v53 }
  0xca   :  { %v118_v56 = vrot.slane %v117_v55, 1 }
  0xcc   :  { %v119_v57 = vadd.f32 %v118_v56, %v117_v55 }
  0xce   :  { %v120_v58 = vadd.f32 %v119_v57, %v76_v29 }
  0xd0   :  { %185 = vtanh.f32 %v120_v58 }
  0xda   :  { %v186_v59 = vpop.eup %185 }
  0xdb   :  { %v124_v60 = vmul.f32 %v186_v59, %v92_v36  ;;  %v122_v61 = vmul.f32 %v186_v59, %v82_v33  ;;  %v123_v62 = vmul.f32 %v186_v59, %v87_v32  ;;  %v125_v63 = vmul.f32 %v186_v59, %v97_v35 }
  0xdc   :  { %v134_v0 = vmul.f32 %v186_v59, %v186_v59 }
  0xdd   :  { %v128_v2 = vadd.f32 %v124_v60, %v105_v43  ;;  %v126_v3 = vadd.f32 %v122_v61, %v103_v42  ;;  %v127_v4 = vadd.f32 %v123_v62, %v104_v41  ;;  %v129_v5 = vadd.f32 %v125_v63, %v106_v46 }
  0xde   :  { %v135_v6 = vsub.f32 1.0, %v134_v0 }
  0xdf   :  { %132 = vst [vmem:[#allocation4 + $0x10] sm:$0xff] %v128_v2  ;;  %130 = vst [vmem:[#allocation4] sm:$0xff] %v126_v3 }
  0xe0   :  { %131 = vst [vmem:[#allocation4 + $0x8] sm:$0xff] %v127_v4  ;;  %133 = vst [vmem:[#allocation4 + $0x18] sm:$0xff] %v129_v5 }
  0xe1   :  { %212 = shalt.err (!%p209_p9)
}
  0xe2   :  { %s213_s0 = scalar_lea.hbm %s369_s5, 512 }
  0xe3   :  { %p214_p10 = scmp.ne.s32.totalorder %s369_s5, %s213_s0  ;;  %p217_p11 = scmp.lt.u32.totalorder %s213_s0, %s369_s5 }
  0xe5   :  { %p219_p12 = pnand %p217_p11, %p214_p10 }
  0xe7   :  { %222 = shalt.err (!%p219_p12)
}
  0xe8   :  { %s254_s9 = smov 128   ;;  %s255_s10 = smov 8   ;;  %v137_v7 = vmul.f32 %v136_v1, %v135_v6  ;;  %v34_v11 = vld [vmem:[%s366_s2] sm:$0x1] }
  0xe9   :  { %155 = dma.vmem_to_hbm [thread:$0]  %s150_s25, 512, %s369_s5, [#allocation5], %s254_s9, %s254_s9, %s255_s10  }
  0xea   :  { %v138_v8 = vadd.f32 1.0, %v137_v7  ;;  %s256_s15 = smov [#allocation6]  }
  0xeb   :  { %s162_s16 = sshll.u32 %s256_s15, 4  ;;  %s163_s16 = int_to_ptr.vmem [resolvable:$true] %s162_s16 }
  0xec   :  { %v139_v9 = vadd.f32 1e-08, %v138_v8  ;;  %s223_s3 = scalar_lea.vmem %s163_s16, 16  ;;  %s227_s17 = scalar_lea.vmem %s163_s16, 32 }
  0xed   :  { %p224_p13 = scmp.ne.s32.totalorder %s163_s16, %s223_s3  ;;  %p228_p0 = scmp.lt.s32.totalorder %s163_s16, %s163_s16 }
  0xee   :  { %187 = vlog2.f32 %v139_v9  ;;  %p229_p1 = scmp.lt.s32.totalorder %s227_s17, %s223_s3 }
  0xf0   :  { %p230_p2 = por %p229_p1, %p228_p0 }
  0xf2   :  { %p231_p3 = pnand %p230_p2, %p224_p13 }
  0xf8   :  { %v188_v10 = vpop.eup %187 }
  0xf9   :  { %v141_v12 = vmul.f32 0.6931472, %v188_v10 }
  0xfb   :  { %v142_v13 = vsub.f32 %v34_v11, %v141_v12 }
  0xfd   :  { %143 = vst [vmem:[#allocation6] sm:$0x1] %v142_v13 }
  0xfe   :  { %234 = shalt.err (!%p231_p3)
}
  0xff   :  { %s235_s19 = scalar_lea.hbm %s370_s6, 16 }
 0x100   :  { %p236_p4 = scmp.ne.s32.totalorder %s370_s6, %s235_s19  ;;  %p239_p5 = scmp.lt.u32.totalorder %s235_s19, %s370_s6 }
 0x102   :  { %p241_p6 = pnand %p239_p5, %p236_p4 }
 0x104   :  { %244 = shalt.err (!%p241_p6)
}
 0x105   :  { %165 = dma.vmem_to_hbm [thread:$0]  %s163_s16, 16, %s370_s6, [#allocation7]  }
 0x106   :  { %247 = dma.done.wait [#allocation5], 512  }
 0x107   :  { %248 = vsyncadd [#allocation5], 4294966784 }
 0x108   :  { %249 = dma.done.wait [#allocation7], 16  }
 0x109   :  { %250 = vsyncadd [#allocation7], 4294967280 }
 0x10a   :  { %172 = vsyncpa [#allocation5], 1 }
 0x10b   :  { %173 = vsyncpa [#allocation7], 1 }

</bundles_post_ra>
